<compile_context>
chip_gen: v5e
topology: v5e:2x2
jax: 0.10.0
libtpu: 0.0.40
codegen_flags: <defaults>
</compile_context>

<pallas_src>
import jax
import jax.numpy as jnp
from jax.experimental import pallas as pl
from jax.experimental.pallas import tpu as pltpu

LANE = 128


def _round_up(x, m):
    return (x + m - 1) // m * m


def mlp_kernel(x_ref, w1_ref, b1_ref, w2_ref, b2_ref, w3_ref, b3_ref, o_ref):
    mm = w1_ref.dtype  # matmul (MXU) dtype, typically bf16; accumulation is f32
    x = x_ref[...].astype(mm)  # in-kernel cast (VPU, hidden under DMA/MXU)
    # linear1 + relu
    h = jnp.dot(x, w1_ref[...], preferred_element_type=jnp.float32)
    h = jnp.maximum(h + b1_ref[...], 0.0)
    # linear2 + relu
    h = jnp.dot(h.astype(mm), w2_ref[...], preferred_element_type=jnp.float32)
    h = jnp.maximum(h + b2_ref[...], 0.0)
    # linear3
    o = jnp.dot(h.astype(mm), w3_ref[...], preferred_element_type=jnp.float32) + b3_ref[...]
    o_ref[...] = o.astype(o_ref.dtype)


def init_params(key, prediction_size, history_size, hidden_size):
    """Deterministic init mimicking torch.nn.Linear default U(-1/sqrt(fan_in), +).
    Weights stored pre-transposed as [in_features, out_features]."""
    ks = jax.random.split(key, 6)

    def linear(kw, kb, fan_in, fan_out):
        bound = 1.0 / (fan_in ** 0.5)
        w = jax.random.uniform(kw, (fan_in, fan_out), jnp.float32, -bound, bound)
        b = jax.random.uniform(kb, (1, fan_out), jnp.float32, -bound, bound)
        return w, b

    w1, b1 = linear(ks[0], ks[1], prediction_size, hidden_size)
    w2, b2 = linear(ks[2], ks[3], hidden_size, hidden_size)
    w3, b3 = linear(ks[4], ks[5], hidden_size, history_size)
    return {"w1": w1, "b1": b1, "w2": w2, "b2": b2, "w3": w3, "b3": b3}


def prepare_params(params, matmul_dtype=jnp.bfloat16):
    """One-time padding/casting of the weights (hoisted out of the hot forward path).

    - output feature dims (hidden, history) are zero-padded to multiples of 128
      for lane-dense MXU tiles and unmasked stores.
    - the K dim of w1 (prediction_size) is left unpadded so x can be passed unpadded.
    """
    w1, b1 = params["w1"], params["b1"]
    w2, b2 = params["w2"], params["b2"]
    w3, b3 = params["w3"], params["b3"]
    P, H = w1.shape
    Hist = w3.shape[1]
    Hp, Op = _round_up(H, LANE), _round_up(Hist, LANE)
    f32 = jnp.float32
    mm = matmul_dtype
    prepared = {
        "w1": jnp.zeros((P, Hp), mm).at[:, :H].set(w1.astype(mm)),
        "b1": jnp.zeros((1, Hp), f32).at[:, :H].set(b1.astype(f32)),
        "w2": jnp.zeros((Hp, Hp), mm).at[:H, :H].set(w2.astype(mm)),
        "b2": jnp.zeros((1, Hp), f32).at[:, :H].set(b2.astype(f32)),
        "w3": jnp.zeros((Hp, Op), mm).at[:H, :Hist].set(w3.astype(mm)),
        "b3": jnp.zeros((1, Op), f32).at[:, :Hist].set(b3.astype(f32)),
    }
    meta = {"prediction_size": P, "hidden_size": H, "history_size": Hist}
    return prepared, meta


def tpalstm_pre_forward(x, prepared, meta, *, block_b=None):
    """Fused forward pass of TPALSTM_pre.

    x:        [B, prediction_size] float32 (unpadded)
    prepared: output of prepare_params() (padded / bf16 weights, f32 biases)
    returns:  [B, history_size] float32
    """
    w1p, b1p = prepared["w1"], prepared["b1"]
    w2p, b2p = prepared["w2"], prepared["b2"]
    w3p, b3p = prepared["w3"], prepared["b3"]
    Hist = meta["history_size"]

    B, P = x.shape
    assert w1p.shape[0] == P, "x feature dim must match prepared w1"
    Hp = w1p.shape[1]
    Op = w3p.shape[1]

    # Batch tiling:
    #  * B <= 1024: one grid step, block == full batch dim (no alignment constraint,
    #    no padding copy, no per-step pipeline overhead).
    #  * large B: tiles up to 2048 rows (multiple of 16 for bf16 sublane packing),
    #    keeping >= 4 grid steps so both v7x TensorCores get work on the parallel axis.
    if block_b is None:
        if B <= 1024:
            block_b = B
        else:
            block_b = min(2048, _round_up(pl.cdiv(B, 4), 16))
    block_b = max(1, block_b)

    if B % block_b == 0:
        Bp, xb = B, x
    else:
        Bp = _round_up(B, block_b)
        xb = jnp.pad(x, ((0, Bp - B), (0, 0)))  # tail padding only when needed

    grid = (Bp // block_b,)

    in_specs = [
        pl.BlockSpec((block_b, P), lambda i: (i, 0)),   # x tile (unpadded, f32)
        pl.BlockSpec((P, Hp), lambda i: (0, 0)),        # w1 (resident, not re-DMA'd)
        pl.BlockSpec((1, Hp), lambda i: (0, 0)),        # b1
        pl.BlockSpec((Hp, Hp), lambda i: (0, 0)),       # w2
        pl.BlockSpec((1, Hp), lambda i: (0, 0)),        # b2
        pl.BlockSpec((Hp, Op), lambda i: (0, 0)),       # w3
        pl.BlockSpec((1, Op), lambda i: (0, 0)),        # b3
    ]
    out_specs = pl.BlockSpec((block_b, Op), lambda i: (i, 0))  # lane-dense stores

    out_pad = pl.pallas_call(
        mlp_kernel,
        out_shape=jax.ShapeDtypeStruct((Bp, Op), jnp.float32),
        grid_spec=pltpu.PrefetchScalarGridSpec(
            num_scalar_prefetch=0,
            grid=grid,
            in_specs=in_specs,
            out_specs=out_specs,
        ),
        compiler_params=pltpu.CompilerParams(
            dimension_semantics=("parallel",),
        ),
    )(xb, w1p, b1p, w2p, b2p, w3p, b3p)

    return out_pad[:B, :Hist]


def reference_forward(x, p, matmul_dtype=jnp.bfloat16):
    """Pure-JAX reference using the same matmul dtype / f32 accumulation."""
    mm = matmul_dtype
    h = jnp.dot(x.astype(mm), p["w1"].astype(mm), preferred_element_type=jnp.float32) + p["b1"]
    h = jnp.maximum(h, 0.0)
    h = jnp.dot(h.astype(mm), p["w2"].astype(mm), preferred_element_type=jnp.float32) + p["b2"]
    h = jnp.maximum(h, 0.0)
    return jnp.dot(h.astype(mm), p["w3"].astype(mm), preferred_element_type=jnp.float32) + p["b3"]


if __name__ == "__main__":
    # Small shapes consistent with the module: prediction_size=16, hidden=48 (default),
    # history_size=24.
    prediction_size = 16
    history_size = 24
    hidden_size = 48

    key = jax.random.PRNGKey(0)
    k_x, k_p, k_x2, k_x3 = jax.random.split(key, 4)
    params = init_params(k_p, prediction_size, history_size, hidden_size)
    prepared, meta = prepare_params(params)  # one-time: padding/cast out of the hot path

    # --- small batch, single grid step, no padding anywhere --------------------
    batch = 16
    x = jax.random.normal(k_x, (batch, prediction_size), dtype=jnp.float32)
    out = jax.block_until_ready(tpalstm_pre_forward(x, prepared, meta))
    ref = reference_forward(x, params)
    assert out.shape == (batch, history_size)
    assert jnp.allclose(out, ref, atol=1e-2, rtol=1e-2), "mismatch vs reference (small batch)"

    # --- unaligned batch (block == full dim, still no padding copy) ------------
    batch_odd = 100
    x_odd = jax.random.normal(k_x3, (batch_odd, prediction_size), dtype=jnp.float32)
    out_odd = jax.block_until_ready(tpalstm_pre_forward(x_odd, prepared, meta))
    ref_odd = reference_forward(x_odd, params)
    assert out_odd.shape == (batch_odd, history_size)
    assert jnp.allclose(out_odd, ref_odd, atol=1e-2, rtol=1e-2), "mismatch (unaligned batch)"

    # --- large batch: multi-step grid with big tiles ----------------------------
    batch2 = 2048
    x2 = jax.random.normal(k_x2, (batch2, prediction_size), dtype=jnp.float32)
    out2 = jax.block_until_ready(tpalstm_pre_forward(x2, prepared, meta))
    ref2 = reference_forward(x2, params)
    assert out2.shape == (batch2, history_size)
    assert jnp.allclose(out2, ref2, atol=1e-2, rtol=1e-2), "mismatch vs reference (large batch)"

    print("KERNEL_OK")
</pallas_src>

<mosaic_0001>
module attributes {stable_mosaic.version = 11 : i64} {
  func.func @mlp_kernel(%arg0: i32, %arg1: memref<16x16xf32, #tpu.memory_space<vmem>>, %arg2: memref<16x128xbf16, #tpu.memory_space<vmem>>, %arg3: memref<1x128xf32, #tpu.memory_space<vmem>>, %arg4: memref<128x128xbf16, #tpu.memory_space<vmem>>, %arg5: memref<1x128xf32, #tpu.memory_space<vmem>>, %arg6: memref<128x128xbf16, #tpu.memory_space<vmem>>, %arg7: memref<1x128xf32, #tpu.memory_space<vmem>>, %arg8: memref<16x128xf32, #tpu.memory_space<vmem>>) attributes {dimension_semantics = [#tpu.dimension_semantics<parallel>], iteration_bounds = array<i64: 1>, scalar_prefetch = 0 : i64, scratch_operands = 0 : i64, tpu.core_type = #tpu.core_type<tc>, window_params = [{transform_indices = @transform_0, window_bounds = array<i64: 16, 16>}, {pipeline_mode = #tpu.pipeline_mode<synchronous>, transform_indices = @transform_1, window_bounds = array<i64: 16, 128>}, {pipeline_mode = #tpu.pipeline_mode<synchronous>, transform_indices = @transform_2, window_bounds = array<i64: 1, 128>}, {pipeline_mode = #tpu.pipeline_mode<synchronous>, transform_indices = @transform_3, window_bounds = array<i64: 128, 128>}, {pipeline_mode = #tpu.pipeline_mode<synchronous>, transform_indices = @transform_4, window_bounds = array<i64: 1, 128>}, {pipeline_mode = #tpu.pipeline_mode<synchronous>, transform_indices = @transform_5, window_bounds = array<i64: 128, 128>}, {pipeline_mode = #tpu.pipeline_mode<synchronous>, transform_indices = @transform_6, window_bounds = array<i64: 1, 128>}, {transform_indices = @transform_7, window_bounds = array<i64: 16, 128>}]} {
    %c0 = arith.constant 0 : index
    %c0_0 = arith.constant 0 : index
    %0 = vector.load %arg1[%c0, %c0_0] : memref<16x16xf32, #tpu.memory_space<vmem>>, vector<16x16xf32>
    %1 = arith.truncf %0 : vector<16x16xf32> to vector<16x16xbf16>
    %c0_1 = arith.constant 0 : index
    %c0_2 = arith.constant 0 : index
    %2 = vector.load %arg2[%c0_1, %c0_2] : memref<16x128xbf16, #tpu.memory_space<vmem>>, vector<16x128xbf16>
    %cst = arith.constant dense<0.000000e+00> : vector<16x128xf32>
    %3 = tpu.matmul %1, %2, %cst {dimension_numbers = #tpu.dot_dimension_numbers<[1], [0], [0], [1], [0, 0, 1, 1], [], []>} : vector<16x16xbf16>, vector<16x128xbf16>, vector<16x128xf32> -> vector<16x128xf32>
    %c0_3 = arith.constant 0 : index
    %c0_4 = arith.constant 0 : index
    %4 = vector.load %arg3[%c0_3, %c0_4] : memref<1x128xf32, #tpu.memory_space<vmem>>, vector<1x128xf32>
    %5 = vector.broadcast %4 : vector<1x128xf32> to vector<16x128xf32>
    %6 = arith.addf %3, %5 : vector<16x128xf32>
    %cst_5 = arith.constant 0.000000e+00 : f32
    %7 = vector.broadcast %cst_5 : f32 to vector<16x128xf32>
    %8 = arith.maximumf %6, %7 : vector<16x128xf32>
    %9 = arith.truncf %8 : vector<16x128xf32> to vector<16x128xbf16>
    %c0_6 = arith.constant 0 : index
    %c0_7 = arith.constant 0 : index
    %10 = vector.load %arg4[%c0_6, %c0_7] : memref<128x128xbf16, #tpu.memory_space<vmem>>, vector<128x128xbf16>
    %cst_8 = arith.constant dense<0.000000e+00> : vector<16x128xf32>
    %11 = tpu.matmul %9, %10, %cst_8 {dimension_numbers = #tpu.dot_dimension_numbers<[1], [0], [0], [1], [0, 0, 1, 1], [], []>} : vector<16x128xbf16>, vector<128x128xbf16>, vector<16x128xf32> -> vector<16x128xf32>
    %c0_9 = arith.constant 0 : index
    %c0_10 = arith.constant 0 : index
    %12 = vector.load %arg5[%c0_9, %c0_10] : memref<1x128xf32, #tpu.memory_space<vmem>>, vector<1x128xf32>
    %13 = vector.broadcast %12 : vector<1x128xf32> to vector<16x128xf32>
    %14 = arith.addf %11, %13 : vector<16x128xf32>
    %cst_11 = arith.constant 0.000000e+00 : f32
    %15 = vector.broadcast %cst_11 : f32 to vector<16x128xf32>
    %16 = arith.maximumf %14, %15 : vector<16x128xf32>
    %17 = arith.truncf %16 : vector<16x128xf32> to vector<16x128xbf16>
    %c0_12 = arith.constant 0 : index
    %c0_13 = arith.constant 0 : index
    %18 = vector.load %arg6[%c0_12, %c0_13] : memref<128x128xbf16, #tpu.memory_space<vmem>>, vector<128x128xbf16>
    %cst_14 = arith.constant dense<0.000000e+00> : vector<16x128xf32>
    %19 = tpu.matmul %17, %18, %cst_14 {dimension_numbers = #tpu.dot_dimension_numbers<[1], [0], [0], [1], [0, 0, 1, 1], [], []>} : vector<16x128xbf16>, vector<128x128xbf16>, vector<16x128xf32> -> vector<16x128xf32>
    %c0_15 = arith.constant 0 : index
    %c0_16 = arith.constant 0 : index
    %20 = vector.load %arg7[%c0_15, %c0_16] : memref<1x128xf32, #tpu.memory_space<vmem>>, vector<1x128xf32>
    %21 = vector.broadcast %20 : vector<1x128xf32> to vector<16x128xf32>
    %22 = arith.addf %19, %21 : vector<16x128xf32>
    %c0_17 = arith.constant 0 : index
    %c0_18 = arith.constant 0 : index
    %23 = vector.load %arg8[%c0_17, %c0_18] : memref<16x128xf32, #tpu.memory_space<vmem>>, vector<16x128xf32>
    tpu.vector_store %arg8[%c0_17, %c0_18], %22 {strides = array<i32>} : memref<16x128xf32, #tpu.memory_space<vmem>>, vector<16x128xf32>,
    return
  }
  func.func @transform_0(%arg0: i32) -> (i32, i32) {
    %c0_i32 = arith.constant 0 : i32
    %c0_i32_0 = arith.constant 0 : i32
    return %arg0, %c0_i32 : i32, i32
  }
  func.func @transform_1(%arg0: i32) -> (i32, i32) {
    %c0_i32 = arith.constant 0 : i32
    %c0_i32_0 = arith.constant 0 : i32
    %c0_i32_1 = arith.constant 0 : i32
    return %c0_i32, %c0_i32_0 : i32, i32
  }
  func.func @transform_2(%arg0: i32) -> (i32, i32) {
    %c0_i32 = arith.constant 0 : i32
    %c0_i32_0 = arith.constant 0 : i32
    %c0_i32_1 = arith.constant 0 : i32
    return %c0_i32, %c0_i32_0 : i32, i32
  }
  func.func @transform_3(%arg0: i32) -> (i32, i32) {
    %c0_i32 = arith.constant 0 : i32
    %c0_i32_0 = arith.constant 0 : i32
    %c0_i32_1 = arith.constant 0 : i32
    return %c0_i32, %c0_i32_0 : i32, i32
  }
  func.func @transform_4(%arg0: i32) -> (i32, i32) {
    %c0_i32 = arith.constant 0 : i32
    %c0_i32_0 = arith.constant 0 : i32
    %c0_i32_1 = arith.constant 0 : i32
    return %c0_i32, %c0_i32_0 : i32, i32
  }
  func.func @transform_5(%arg0: i32) -> (i32, i32) {
    %c0_i32 = arith.constant 0 : i32
    %c0_i32_0 = arith.constant 0 : i32
    %c0_i32_1 = arith.constant 0 : i32
    return %c0_i32, %c0_i32_0 : i32, i32
  }
  func.func @transform_6(%arg0: i32) -> (i32, i32) {
    %c0_i32 = arith.constant 0 : i32
    %c0_i32_0 = arith.constant 0 : i32
    %c0_i32_1 = arith.constant 0 : i32
    return %c0_i32, %c0_i32_0 : i32, i32
  }
  func.func @transform_7(%arg0: i32) -> (i32, i32) {
    %c0_i32 = arith.constant 0 : i32
    %c0_i32_0 = arith.constant 0 : i32
    return %arg0, %c0_i32 : i32, i32
  }
}

</mosaic_0001>

<bundles_post_ra>
// kernel: tpu_custom_call.1
= control target key start
LH: loop header
LB: loop body
LE: loop exit
PB: predicated region body
PF: predicated region fallthrough
CT: control target
= control target key end

     0   :  { %12 = vsyncpa [#allocation3], 0  ;;  %s622_s0 = inlined_call_operand.hbm [shape: f32[16,16], index: 0, kind: input, shape index: {}]   ;;  %s623_s1 = inlined_call_operand.hbm [shape: bf16[16,128], index: 1, kind: input, shape index: {}]   ;;  %s624_s2 = inlined_call_operand.vmem [shape: f32[1,128], index: 2, kind: input, shape index: {}]   ;;  %s625_s3 = inlined_call_operand.hbm [shape: bf16[128,128], index: 3, kind: input, shape index: {}]   ;;  %s626_s4 = inlined_call_operand.vmem [shape: f32[1,128], index: 4, kind: input, shape index: {}]   ;;  %s627_s5 = inlined_call_operand.hbm [shape: bf16[128,128], index: 5, kind: input, shape index: {}]   ;;  %s628_s6 = inlined_call_operand.vmem [shape: f32[1,128], index: 6, kind: input, shape index: {}]   ;;  %s629_s7 = inlined_call_operand.hbm [shape: f32[16,128], index: 7, kind: output, shape index: {}]  }
   0x1   :  { %13 = vsyncpa [#allocation6], 0 }
   0x2   :  { %14 = vsyncpa [#allocation9], 0  ;;  %s33_s26 = sshll.u32 %s623_s1, 4  ;;  %s34_s26 = int_to_ptr.hbm [resolvable:$true] %s33_s26 }
   0x3   :  { %15 = vsyncpa [#allocation4], 0  ;;  %s543_s27 = smov [#allocation5]   ;;  %s20_s8 = sshll.u32 %s622_s0, 4  ;;  %s21_s8 = int_to_ptr.hbm [resolvable:$true] %s20_s8 }
   0x4   :  { %s35_s28 = sshll.u32 %s543_s27, 4  ;;  %s544_s9 = smov 64   ;;  %s36_s28 = int_to_ptr.vmem [resolvable:$true] %s35_s28 }
   0x5   :  { %s545_s10 = smov 4   ;;  %s546_s11 = smov [#allocation2]  }
   0x6   :  { %41 = dma.hbm_to_vmem [thread:$0]  %s34_s26, 128, %s36_s28, [#allocation6], %s544_s9, %s544_s9, %s545_s10  }
   0x7   :  { %s22_s12 = sshll.u32 %s546_s11, 4  ;;  %s547_s13 = smov 128   ;;  %s23_s12 = int_to_ptr.vmem [resolvable:$true] %s22_s12 }
   0x8   :  { %s548_s14 = smov 8   ;;  %s48_s16 = sshll.u32 %s625_s3, 4  ;;  %s49_s16 = int_to_ptr.hbm [resolvable:$true] %s48_s16 }
   0x9   :  { %28 = dma.hbm_to_vmem [thread:$0]  %s21_s8, 256, %s23_s12, [#allocation3], %s547_s13, %s547_s13, %s548_s14  }
   0xa   :  { %s549_s17 = smov [#allocation7]   ;;  %s63_s20 = sshll.u32 %s627_s5, 4  ;;  %s64_s20 = int_to_ptr.hbm [resolvable:$true] %s63_s20 }
   0xb   :  { %s50_s0 = sshll.u32 %s549_s17, 4  ;;  %s550_s21 = smov [#allocation8]   ;;  %s51_s0 = int_to_ptr.vmem [resolvable:$true] %s50_s0 }
   0xc   :  { %56 = dma.hbm_to_vmem [thread:$0]  %s49_s16, 1024, %s51_s0, [#allocation6], %s544_s9, %s544_s9, %s545_s10  }
   0xd   :  { %s65_s22 = sshll.u32 %s550_s21, 4  ;;  %s66_s22 = int_to_ptr.vmem [resolvable:$true] %s65_s22 }
   0xe   :  { %71 = dma.hbm_to_vmem [thread:$0]  %s64_s20, 1024, %s66_s22, [#allocation9], %s544_s9, %s544_s9, %s545_s10  }
   0xf   :  { %535 = dma.done.wait [#allocation3], 256  }
  0x10   :  { %536 = vsyncadd [#allocation3], 4294967040 }
  0x11   :  { %537 = dma.done.wait [#allocation6], 1152  }
  0x12   :  { %538 = vsyncadd [#allocation6], 4294966144 }
  0x13   :  { %539 = dma.done.wait [#allocation9], 1024  }
  0x14   :  { %540 = vsyncadd [#allocation9], 4294966272  ;;  %v386_v0 = vld [vmem:[#allocation5] sm:$0xff]  ;;  %v91_v1 = vld [vmem:[#allocation2] sm:$0xff]  ;;  %vm106_vm0 = vcmask 130048   ;;  %s551_s26 = smov [#allocation10]  }
  0x15   :  { %v92_v2 = vld [vmem:[#allocation2 + $0x8] sm:$0xff]  ;;  %v394_v4 = vld [vmem:[#allocation7 + $0x38] sm:$0xff]  ;;  %117 = vmatpush.bf16.msra.mxu0 %v386_v0  ;;  %v392_v6 = vld [vmem:[#allocation7 + $0x28] sm:$0xff]  ;;  %s300_s27 = sshll.u32 %s551_s26, 4  ;;  %s301_s27 = int_to_ptr.vmem [resolvable:$true] %s300_s27 }
  0x16   :  { %v93_v3 = vpack.c.bf16 %v92_v2, %v91_v1  ;;  %195 = vmatpush.bf16.msra.mxu1 %v394_v4  ;;  %v393_v5 = vld [vmem:[#allocation7 + $0x30] sm:$0xff]  ;;  %v391_v7 = vld [vmem:[#allocation7 + $0x20] sm:$0xff]  ;;  %v390_v8 = vld [vmem:[#allocation7 + $0x18] sm:$0xff] }
  0x17   :  { %v389_v9 = vld [vmem:[#allocation7 + $0x10] sm:$0xff]  ;;  %v388_v10 = vld [vmem:[#allocation7 + $0x8] sm:$0xff]  ;;  %v387_v11 = vld [vmem:[#allocation7] sm:$0xff] }
  0x18   :  { %321 = vmatmul.msk.bf16.vlgmr.msra.gmra.mxu0 %vm106_vm0, %v93_v3  ;;  %v402_v12 = vld [vmem:[#allocation8 + $0x38] sm:$0xff]  ;;  %v401_v13 = vld [vmem:[#allocation8 + $0x30] sm:$0xff]  ;;  %v400_v14 = vld [vmem:[#allocation8 + $0x28] sm:$0xff] }
  0x19   :  { %280 = vmatpush.bf16.msra.mxu2 %v402_v12  ;;  %v399_v15 = vld [vmem:[#allocation8 + $0x20] sm:$0xff]  ;;  %v412_v17 = vld [vmem:[%s624_s2] ss:$0 sm:$0xff]  ;;  %v398_v24 = vld [vmem:[#allocation8 + $0x18] sm:$0xff] }
  0x1a   :  { %196 = vmatpush.bf16.msra.mxu1 %v393_v5  ;;  %v397_v25 = vld [vmem:[#allocation8 + $0x10] sm:$0xff]  ;;  %v396_v26 = vld [vmem:[#allocation8 + $0x8] sm:$0xff]  ;;  %v395_v27 = vld [vmem:[#allocation8] sm:$0xff] }
  0x1b   :  { %v413_v29 = vld [vmem:[%s626_s4] ss:$0 sm:$0xff]  ;;  %s302_s4 = sshll.u32 %s629_s7, 4  ;;  %s303_s4 = int_to_ptr.hbm [resolvable:$true] %s302_s4 }
  0x1c   :  { %v414_v36 = vld [vmem:[%s628_s6] ss:$0 sm:$0xff] }
  0x1d   :  { %281 = vmatpush.bf16.msra.mxu2 %v401_v13 }
  0x1e   :  { %197 = vmatpush.bf16.msra.mxu1 %v392_v6 }
  0x21   :  { %282 = vmatpush.bf16.msra.mxu2 %v400_v14 }
  0x22   :  { %198 = vmatpush.bf16.msra.mxu1 %v391_v7 }
  0x25   :  { %283 = vmatpush.bf16.msra.mxu2 %v399_v15 }
  0x26   :  { %199 = vmatpush.bf16.msra.mxu1 %v390_v8 }
  0x29   :  { %284 = vmatpush.bf16.msra.mxu2 %v398_v24 }
  0x2a   :  { %200 = vmatpush.bf16.msra.mxu1 %v389_v9 }
  0x2d   :  { %285 = vmatpush.bf16.msra.mxu2 %v397_v25 }
  0x2e   :  { %201 = vmatpush.bf16.msra.mxu1 %v388_v10 }
  0x31   :  { %286 = vmatpush.bf16.msra.mxu2 %v396_v26 }
  0x32   :  { %202 = vmatpush.bf16.msra.mxu1 %v387_v11 }
  0x35   :  { %287 = vmatpush.bf16.msra.mxu2 %v395_v27 }
  0x95   :  { %v119_v16 = vpop.f32.mrf.mxu0 }
  0x96   :  { %v120_v18 = vadd.f32 %v412_v17, %v119_v16 }
  0x98   :  { %v124_v21 = vmax.f32 %v120_v18, 0.0 }
  0x9d   :  { %v121_v19 = vpop.f32.mrf.mxu0 }
  0x9e   :  { %v122_v20 = vadd.f32 %v412_v17, %v121_v19 }
  0xa0   :  { %v125_v22 = vmax.f32 %v122_v20, 0.0 }
  0xa2   :  { %v126_v23 = vpack.c.bf16 %v125_v22, %v124_v21 }
  0xa4   :  { %203 = vmatmul.bf16.vlgmr.msra.gmra.mxu1 %v126_v23 }
 0x121   :  { %v204_v28 = vpop.f32.mrf.mxu1 }
 0x122   :  { %v205_v30 = vadd.f32 %v413_v29, %v204_v28 }
 0x124   :  { %v209_v33 = vmax.f32 %v205_v30, 0.0 }
 0x129   :  { %v206_v31 = vpop.f32.mrf.mxu1 }
 0x12a   :  { %v207_v32 = vadd.f32 %v413_v29, %v206_v31 }
 0x12c   :  { %v210_v34 = vmax.f32 %v207_v32, 0.0 }
 0x12e   :  { %v211_v35 = vpack.c.bf16 %v210_v34, %v209_v33 }
 0x130   :  { %288 = vmatmul.bf16.vlgmr.msra.gmra.mxu2 %v211_v35 }
 0x1b3   :  { %v289_v37 = vpop.f32.mrf.mxu2 }
 0x1b4   :  { %v290_v38 = vadd.f32 %v414_v36, %v289_v37 }
 0x1b6   :  { %294 = vst [vmem:[#allocation10] sm:$0xff] %v290_v38 }
 0x1bb   :  { %v291_v39 = vpop.f32.mrf.mxu2 }
 0x1bc   :  { %v292_v40 = vadd.f32 %v414_v36, %v291_v39 }
 0x1be   :  { %295 = vst [vmem:[#allocation10 + $0x8] sm:$0xff] %v292_v40 }
 0x1bf   :  { %308 = dma.vmem_to_hbm [thread:$0]  %s301_s27, 256, %s303_s4, [#allocation4], %s547_s13, %s547_s13, %s548_s14  }
 0x1c0   :  { %541 = dma.done.wait [#allocation4], 256  }
 0x1c1   :  { %542 = vsyncadd [#allocation4], 4294967040 }
 0x1c2   :  { %313 = vsyncpa [#allocation3], 1 }
 0x1c3   :  { %314 = vsyncpa [#allocation6], 1 }
 0x1c4   :  { %315 = vsyncpa [#allocation9], 1 }
 0x1c5   :  { %316 = vsyncpa [#allocation4], 1 }

</bundles_post_ra>
